<compile_context>
chip_gen: v5e
topology: v5e:2x2
jax: 0.10.0
libtpu: 0.0.40
codegen_flags: <defaults>
</compile_context>

<pallas_src>
import functools

import jax
import jax.numpy as jnp
import numpy as np
from jax.experimental import pallas as pl
from jax.experimental.pallas import tpu as pltpu


# ---------------------------------------------------------------------------
# Shared tiling helper: pick a lane tile T (multiple of 128) for H*W pixels.
# ---------------------------------------------------------------------------
def _pick_tile(hw, tile_pixels):
    tile_pixels = max(128, (tile_pixels // 128) * 128)
    if hw % 128 == 0:
        t = min(tile_pixels, hw)
        t = (t // 128) * 128
        while t >= 128 and hw % t != 0:
            t -= 128
        if t >= 128:
            return t, hw                     # no padding needed
    t = min(tile_pixels, ((hw + 127) // 128) * 128)
    hw_pad = ((hw + t - 1) // t) * t
    return t, hw_pad


# ---------------------------------------------------------------------------
# Kernel 1: forward head = GlobalAvgPool + Linear(in_features, num_classes)
# ---------------------------------------------------------------------------
def _head_kernel(feat_ref, w_ref, b_ref, out_ref, acc_ref, *, inv_hw):
    """feat_ref: (N, F, T)  backbone features, pixels on lanes
       w_ref:    (F, K)     classifier weight (pre-transposed)
       b_ref:    (1, K)     classifier bias
       out_ref:  (N, K)     logits
       acc_ref:  VMEM (N, F) f32 running pixel-sum."""
    i = pl.program_id(0)

    @pl.when(i == 0)
    def _():
        acc_ref[...] = jnp.zeros_like(acc_ref)

    # Cross-lane (XLU) reduce of this pixel tile into the pooled-sum scratch.
    acc_ref[...] += jnp.sum(feat_ref[...].astype(jnp.float32), axis=2)

    @pl.when(i == pl.num_programs(0) - 1)
    def _():
        pooled = acc_ref[...] * inv_hw                               # (N, F)
        logits = jnp.dot(pooled, w_ref[...].astype(jnp.float32),
                         preferred_element_type=jnp.float32)
        logits = logits + b_ref[...].astype(jnp.float32)
        out_ref[...] = logits.astype(out_ref.dtype)


def efficientnetv2_binary_head(features, weight, bias, *, tile_pixels=2048):
    """features: (N, F, H, W) backbone feature map; weight: (K, F); bias: (K,).
    Returns (N, K) logits == Linear(GlobalAvgPool(features)) — the module's head."""
    N, F, H, W = features.shape
    K = weight.shape[0]
    HW = H * W
    T, HWp = _pick_tile(HW, tile_pixels)

    feats = features.reshape(N, F, HW)           # free relayout: pixels -> lanes
    if HWp != HW:
        feats = jnp.pad(feats, ((0, 0), (0, 0), (0, HWp - HW)))  # zeros: sum unchanged
    w_t = weight.T                                # (F, K) for MXU contraction
    b = bias.reshape(1, K)

    kernel = functools.partial(_head_kernel, inv_hw=1.0 / HW)
    return pl.pallas_call(
        kernel,
        out_shape=jax.ShapeDtypeStruct((N, K), features.dtype),
        grid_spec=pltpu.PrefetchScalarGridSpec(
            num_scalar_prefetch=0,
            grid=(HWp // T,),
            in_specs=[
                pl.BlockSpec((N, F, T), lambda i: (0, 0, i)),
                pl.BlockSpec((F, K), lambda i: (0, 0)),
                pl.BlockSpec((1, K), lambda i: (0, 0)),
            ],
            out_specs=pl.BlockSpec((N, K), lambda i: (0, 0)),
            scratch_shapes=[pltpu.VMEM((N, F), jnp.float32)],
        ),
        compiler_params=pltpu.CompilerParams(
            dimension_semantics=("arbitrary",),
        ),
    )(feats, w_t, b)


def _head_reference(features, weight, bias):
    pooled = features.astype(jnp.float32).mean(axis=(2, 3))
    return pooled @ weight.astype(jnp.float32).T + bias.astype(jnp.float32)


# ---------------------------------------------------------------------------
# Kernel 2: class-balanced NLL over log_softmax (the train.py loss)
# ---------------------------------------------------------------------------
def _ce_kernel(logits_ref, tgt_ref, nll_ref, cnt_ref):
    """One tile: pixels on lanes, classes on sublanes.

    logits_ref: (1, C, T)  input dtype  logits for one batch row, T pixels
    tgt_ref:    (1, 1, T)  int8/int32   labels (-1 on padded pixels)
    nll_ref:    (1, C, T)  f32          per-class, per-lane NLL partial sums
    cnt_ref:    (1, C, T)  f32          per-class, per-lane pixel counts
    """
    @pl.when(pl.program_id(1) == 0)
    def _():
        nll_ref[...] = jnp.zeros_like(nll_ref)
        cnt_ref[...] = jnp.zeros_like(cnt_ref)

    x = logits_ref[0].astype(jnp.float32)          # (C, T)
    t = tgt_ref[0].astype(jnp.int32)               # (1, T)

    # log-sum-exp over the small class/sublane axis; never materialize full logp.
    m = jnp.max(x, axis=0, keepdims=True)                           # (1, T)
    lse = jnp.log(jnp.sum(jnp.exp(x - m), axis=0, keepdims=True))   # (1, T)

    classes = jax.lax.broadcasted_iota(jnp.int32, x.shape, 0)       # (C, T)
    onehot = (t == classes).astype(jnp.float32)                     # padded rows (t=-1) -> 0

    # -log_softmax(x)[t], gathered via one-hot:  onehot * (m + lse - x)
    nll_ref[0] = nll_ref[0] + onehot * ((m + lse) - x)
    cnt_ref[0] = cnt_ref[0] + onehot


def custom_cross_entropy_loss(logits, target, *, tile_pixels=2048):
    """logits: (N, C, H, W) float; target: (N, H, W) int.  Returns scalar loss."""
    N, C, H, W = logits.shape
    HW = H * W
    T, HWp = _pick_tile(HW, tile_pixels)

    # Free relayout: NCHW -> (N, C, H*W); pixels land on the lane axis.
    x = logits.reshape(N, C, HW)
    tgt_dtype = jnp.int8 if C <= 127 else jnp.int32
    t = target.reshape(N, 1, HW).astype(tgt_dtype)

    if HWp != HW:
        x = jnp.pad(x, ((0, 0), (0, 0), (0, HWp - HW)))
        t = jnp.pad(t, ((0, 0), (0, 0), (0, HWp - HW)), constant_values=-1)

    grid = (N, HWp // T)
    nll_acc, cnt_acc = pl.pallas_call(
        _ce_kernel,
        out_shape=(
            jax.ShapeDtypeStruct((N, C, T), jnp.float32),
            jax.ShapeDtypeStruct((N, C, T), jnp.float32),
        ),
        grid_spec=pltpu.PrefetchScalarGridSpec(
            num_scalar_prefetch=0,
            grid=grid,
            in_specs=[
                pl.BlockSpec((1, C, T), lambda n, i: (n, 0, i)),
                pl.BlockSpec((1, 1, T), lambda n, i: (n, 0, i)),
            ],
            out_specs=[
                pl.BlockSpec((1, C, T), lambda n, i: (n, 0, 0)),
                pl.BlockSpec((1, C, T), lambda n, i: (n, 0, 0)),
            ],
        ),
        compiler_params=pltpu.CompilerParams(
            dimension_semantics=("parallel", "arbitrary"),
        ),
    )(x, t)

    # Tiny O(N*C*T) glue reductions + O(C) weight math.
    nll_sum = jnp.sum(nll_acc, axis=(0, 2))   # (C,)
    counts = jnp.sum(cnt_acc, axis=(0, 2))    # (C,)

    total_pixels = jnp.sum(counts)
    class_frequencies = counts / (total_pixels + 1e-6)
    class_weights = 1.0 / (class_frequencies + 1e-6)
    class_weights = class_weights / jnp.sum(class_weights)

    # F.nll_loss(reduction='mean') with per-class weights.
    loss = jnp.sum(class_weights * nll_sum) / jnp.sum(class_weights * counts)
    return loss


def _loss_reference(logits, target):
    """Pure-JAX reference mirroring the PyTorch loss."""
    N, C, H, W = logits.shape
    flat = target.reshape(-1)
    counts = jnp.bincount(flat, length=C).astype(jnp.float32)
    total = jnp.sum(counts)
    freq = counts / (total + 1e-6)
    w = 1.0 / (freq + 1e-6)
    w = w / jnp.sum(w)
    logp = jax.nn.log_softmax(logits.astype(jnp.float32), axis=1)
    logp_pc = jnp.transpose(logp, (0, 2, 3, 1)).reshape(-1, C)
    lp_t = logp_pc[jnp.arange(flat.shape[0]), flat]
    wt = w[flat]
    return jnp.sum(wt * (-lp_t)) / jnp.sum(wt)


if __name__ == "__main__":
    key = jax.random.PRNGKey(0)
    k1, k2, k3, k4 = jax.random.split(key, 4)

    # ---- Forward head: GAP + binary Linear classifier ----------------------
    N, F, Hh, Wh, K = 2, 64, 16, 16, 2
    feats = jax.random.normal(k1, (N, F, Hh, Wh), dtype=jnp.float32)
    w_cls = jax.random.normal(k2, (K, F), dtype=jnp.float32) * 0.05
    b_cls = jax.random.normal(k3, (K,), dtype=jnp.float32) * 0.05

    logits_head = jax.block_until_ready(
        efficientnetv2_binary_head(feats, w_cls, b_cls, tile_pixels=128))
    ref_head = jax.block_until_ready(_head_reference(feats, w_cls, b_cls))
    np.testing.assert_allclose(np.asarray(logits_head), np.asarray(ref_head),
                               rtol=1e-5, atol=1e-5)

    # Head with H*W not a multiple of 128 -> exercises lane padding.
    feats2 = jax.random.normal(k4, (1, 64, 10, 10), dtype=jnp.float32)
    logits_head2 = jax.block_until_ready(
        efficientnetv2_binary_head(feats2, w_cls, b_cls))
    ref_head2 = jax.block_until_ready(_head_reference(feats2, w_cls, b_cls))
    np.testing.assert_allclose(np.asarray(logits_head2), np.asarray(ref_head2),
                               rtol=1e-5, atol=1e-5)

    # ---- Class-balanced CE loss (train.py) ---------------------------------
    kl1, kl2, kl3, kl4 = jax.random.split(k2, 4)

    # Case 1: multi-tile grid with batch "parallel" axis (HW=1024, 4 lane-tiles).
    Nl, Cl, Hl, Wl = 2, 5, 32, 32
    logits = jax.random.normal(kl1, (Nl, Cl, Hl, Wl), dtype=jnp.float32)
    target = jax.random.randint(kl2, (Nl, Hl, Wl), 0, Cl, dtype=jnp.int32)
    flat = target.reshape(-1).at[:Cl].set(jnp.arange(Cl, dtype=jnp.int32))
    target = flat.reshape(Nl, Hl, Wl)

    loss = jax.block_until_ready(
        custom_cross_entropy_loss(logits, target, tile_pixels=256))
    ref = jax.block_until_ready(_loss_reference(logits, target))
    np.testing.assert_allclose(np.asarray(loss), np.asarray(ref),
                               rtol=1e-5, atol=1e-5)

    # Case 2: H*W not a multiple of 128 -> exercises lane padding with t=-1.
    N2, C2, H2, W2 = 1, 5, 10, 10
    logits2 = jax.random.normal(kl3, (N2, C2, H2, W2), dtype=jnp.float32)
    target2 = jax.random.randint(kl4, (N2, H2, W2), 0, C2, dtype=jnp.int32)
    flat2 = target2.reshape(-1).at[:C2].set(jnp.arange(C2, dtype=jnp.int32))
    target2 = flat2.reshape(N2, H2, W2)

    loss2 = jax.block_until_ready(custom_cross_entropy_loss(logits2, target2))
    ref2 = jax.block_until_ready(_loss_reference(logits2, target2))
    np.testing.assert_allclose(np.asarray(loss2), np.asarray(ref2),
                               rtol=1e-5, atol=1e-5)

    print("KERNEL_OK")
</pallas_src>

<mosaic_0001>
module attributes {stable_mosaic.version = 11 : i64} {
  func.func @_head_kernel(%arg0: i32, %arg1: memref<2x64x128xf32, #tpu.memory_space<vmem>>, %arg2: memref<64x2xf32, #tpu.memory_space<vmem>>, %arg3: memref<1x2xf32, #tpu.memory_space<vmem>>, %arg4: memref<2x2xf32, #tpu.memory_space<vmem>>, %arg5: memref<2x64xf32, #tpu.memory_space<vmem>>) attributes {dimension_semantics = [#tpu.dimension_semantics<arbitrary>], iteration_bounds = array<i64: 2>, scalar_prefetch = 0 : i64, scratch_operands = 1 : i64, tpu.core_type = #tpu.core_type<tc>, window_params = [{transform_indices = @transform_0, window_bounds = array<i64: 2, 64, 128>}, {pipeline_mode = #tpu.pipeline_mode<synchronous>, transform_indices = @transform_1, window_bounds = array<i64: 64, 2>}, {pipeline_mode = #tpu.pipeline_mode<synchronous>, transform_indices = @transform_2, window_bounds = array<i64: 1, 2>}, {pipeline_mode = #tpu.pipeline_mode<synchronous>, transform_indices = @transform_3, window_bounds = array<i64: 2, 2>}]} {
    %c0_i32 = arith.constant 0 : i32
    %0 = arith.cmpi eq, %arg0, %c0_i32 : i32
    %1 = arith.extui %0 : i1 to i32
    %c0_i32_0 = arith.constant 0 : i32
    %2 = arith.cmpi ne, %1, %c0_i32_0 : i32
    scf.if %2 {
      %cst_8 = arith.constant 0.000000e+00 : f32
      %11 = vector.broadcast %cst_8 : f32 to vector<2x64xf32>
      %c0_9 = arith.constant 0 : index
      %c0_10 = arith.constant 0 : index
      %12 = vector.load %arg5[%c0_9, %c0_10] : memref<2x64xf32, #tpu.memory_space<vmem>>, vector<2x64xf32>
      tpu.vector_store %arg5[%c0_9, %c0_10], %11 {strides = array<i32>} : memref<2x64xf32, #tpu.memory_space<vmem>>, vector<2x64xf32>,
    } else {
    }
    %c0 = arith.constant 0 : index
    %c0_1 = arith.constant 0 : index
    %3 = vector.load %arg5[%c0, %c0_1] : memref<2x64xf32, #tpu.memory_space<vmem>>, vector<2x64xf32>
    %c0_2 = arith.constant 0 : index
    %c0_3 = arith.constant 0 : index
    %c0_4 = arith.constant 0 : index
    %4 = vector.load %arg1[%c0_2, %c0_3, %c0_4] : memref<2x64x128xf32, #tpu.memory_space<vmem>>, vector<2x64x128xf32>
    %cst = arith.constant dense<0.000000e+00> : vector<2x64xf32>
    %5 = vector.multi_reduction <add>, %4, %cst [2] : vector<2x64x128xf32> to vector<2x64xf32>
    %6 = arith.addf %3, %5 : vector<2x64xf32>
    %c0_5 = arith.constant 0 : index
    %c0_6 = arith.constant 0 : index
    %7 = vector.load %arg5[%c0_5, %c0_6] : memref<2x64xf32, #tpu.memory_space<vmem>>, vector<2x64xf32>
    tpu.vector_store %arg5[%c0_5, %c0_6], %6 {strides = array<i32>} : memref<2x64xf32, #tpu.memory_space<vmem>>, vector<2x64xf32>,
    %c1_i32 = arith.constant 1 : i32
    %8 = arith.cmpi eq, %arg0, %c1_i32 : i32
    %9 = arith.extui %8 : i1 to i32
    %c0_i32_7 = arith.constant 0 : i32
    %10 = arith.cmpi ne, %9, %c0_i32_7 : i32
    scf.if %10 {
      %c0_8 = arith.constant 0 : index
      %c0_9 = arith.constant 0 : index
      %11 = vector.load %arg5[%c0_8, %c0_9] : memref<2x64xf32, #tpu.memory_space<vmem>>, vector<2x64xf32>
      %cst_10 = arith.constant 3.906250e-03 : f32
      %12 = vector.broadcast %cst_10 : f32 to vector<2x64xf32>
      %13 = arith.mulf %11, %12 : vector<2x64xf32>
      %c0_11 = arith.constant 0 : index
      %c0_12 = arith.constant 0 : index
      %14 = vector.load %arg2[%c0_11, %c0_12] : memref<64x2xf32, #tpu.memory_space<vmem>>, vector<64x2xf32>
      %cst_13 = arith.constant dense<0.000000e+00> : vector<2x2xf32>
      %15 = tpu.matmul %13, %14, %cst_13 {dimension_numbers = #tpu.dot_dimension_numbers<[1], [0], [0], [1], [0, 0, 1, 1], [], []>} : vector<2x64xf32>, vector<64x2xf32>, vector<2x2xf32> -> vector<2x2xf32>
      %c0_14 = arith.constant 0 : index
      %c0_15 = arith.constant 0 : index
      %16 = vector.load %arg3[%c0_14, %c0_15] : memref<1x2xf32, #tpu.memory_space<vmem>>, vector<1x2xf32>
      %17 = vector.broadcast %16 : vector<1x2xf32> to vector<2x2xf32>
      %18 = arith.addf %15, %17 : vector<2x2xf32>
      %c0_16 = arith.constant 0 : index
      %c0_17 = arith.constant 0 : index
      %19 = vector.load %arg4[%c0_16, %c0_17] : memref<2x2xf32, #tpu.memory_space<vmem>>, vector<2x2xf32>
      tpu.vector_store %arg4[%c0_16, %c0_17], %18 {strides = array<i32>} : memref<2x2xf32, #tpu.memory_space<vmem>>, vector<2x2xf32>,
    } else {
    }
    return
  }
  func.func @transform_0(%arg0: i32) -> (i32, i32, i32) {
    %c0_i32 = arith.constant 0 : i32
    %c0_i32_0 = arith.constant 0 : i32
    %c0_i32_1 = arith.constant 0 : i32
    return %c0_i32, %c0_i32_0, %arg0 : i32, i32, i32
  }
  func.func @transform_1(%arg0: i32) -> (i32, i32) {
    %c0_i32 = arith.constant 0 : i32
    %c0_i32_0 = arith.constant 0 : i32
    %c0_i32_1 = arith.constant 0 : i32
    return %c0_i32, %c0_i32_0 : i32, i32
  }
  func.func @transform_2(%arg0: i32) -> (i32, i32) {
    %c0_i32 = arith.constant 0 : i32
    %c0_i32_0 = arith.constant 0 : i32
    %c0_i32_1 = arith.constant 0 : i32
    return %c0_i32, %c0_i32_0 : i32, i32
  }
  func.func @transform_3(%arg0: i32) -> (i32, i32) {
    %c0_i32 = arith.constant 0 : i32
    %c0_i32_0 = arith.constant 0 : i32
    %c0_i32_1 = arith.constant 0 : i32
    return %c0_i32, %c0_i32_0 : i32, i32
  }
}

</mosaic_0001>

<bundles_post_ra>
// kernel: tpu_custom_call.1
= control target key start
LH: loop header
LB: loop body
LE: loop exit
PB: predicated region body
PF: predicated region fallthrough
CT: control target
= control target key end

     0   :  { %8 = vsyncpa [#allocation4], 0  ;;  %s732_s0 = inlined_call_operand.hbm [shape: f32[2,64,256], index: 0, kind: input, shape index: {}]   ;;  %s733_s1 = inlined_call_operand.vmem [shape: f32[64,2], index: 1, kind: input, shape index: {}]   ;;  %s734_s2 = inlined_call_operand.vmem [shape: f32[1,2], index: 2, kind: input, shape index: {}]   ;;  %s735_s3 = inlined_call_operand.hbm [shape: f32[2,2], index: 3, kind: output, shape index: {}]  }
   0x1   :  { %10 = vsyncpa [#allocation4 + $0x1], 0 }
   0x2   :  { %11 = vsyncpa [#allocation5], 0  ;;  %s592_s12 = smov 0   ;;  %s594_s13 = smov 0  }
   0x3   :  { %s596_s14 = smov 0   ;;  %s598_s15 = smov 0  }
   0x4 LB: > { %s611_s16 = sadd.s32 4294967295, %s565_s15   ;;  %s614_s17 = sadd.s32 1, %s565_s15   ;;  %s565_s15 = sphi %s598_s15, %s742_s15   ;;  %s561_s14 = sphi %s596_s14, %s741_s14   ;;  %s557_s13 = sphi %s594_s13, %s740_s13   ;;  %s553_s12 = sphi %s592_s12, %s739_s12  }
   0x5   : > { %s21_s18 = ssub.s32 %s565_s15, %s614_s17  ;;  %s24_s19 = sadd.s32 1, %s561_s14 }
   0x6   : > { %p22_p0 = scmp.eq.s32.totalorder %s21_s18, 0  ;;  %p31_p1 = scmp.ne.s32.totalorder %s561_s14, %s557_s13 }
   0x7   : > { %p32_p2 = scmp.eq.s32.totalorder %s565_s15, 0  ;;  %p37_p3 = scmp.ne.s32.totalorder %s557_s13, %s553_s12 }
   0x8   : > { %s624_s20 = scalar_select %p22_p0, %s561_s14, %s24_s19  }
   0x9   : > { %p626_p4 = por %p32_p2, %p31_p1  ;;  %p38_p5 = scmp.eq.s32.totalorder %s611_s16, 0 }
   0xa   : > { %p428_p6 = scmp.lt.s32.totalorder %s565_s15, 2  ;;  %s130_s23 = sand.u32 1, %s561_s14  }
   0xb   : > { %p632_p7 = por %p38_p5, %p37_p3  ;;  %s407_s24 = sshll.u32 %s130_s23, 7 }
   0xc   : > { %s408_s25 = sshll.u32 %s565_s15, 3  ;;  %s134_s29 = scalar_lea.vmem [#allocation3], %s407_s24 }
   0xd   : > { %s138_s28 = scalar_lea.hbm %s732_s0, %s408_s25  ;;  %s141_s30 = sshll.u32 %s134_s29, 4  ;;  %s142_s30 = int_to_ptr.vmem [resolvable:$true] %s141_s30 }
   0xe   : > { %s139_s4 = sshll.u32 %s138_s28, 4  ;;  %p643_p8 = pnand %p428_p6, %p626_p4  ;;  %s140_s4 = int_to_ptr.hbm [resolvable:$true] %s139_s4 }
   0xf   : > { %s131_s6 = scalar_lea.sflag [#allocation4], %s130_s23  ;;  %s469_s7 = sshra.s32 %s140_s4, 4  ;;  %s470_s7 = int_to_ptr.hbm [resolvable:$true] %s469_s7 }
  0x10   : > { %s471_s8 = scalar_lea.hbm %s470_s7, 128  ;;  %p473_p10 = pneg %p643_p8 }
  0x11   : > { %p472_p9 = scmp.ne.s32.totalorder %s470_s7, %s471_s8  ;;  %s476_s11 = scalar_lea.hbm %s732_s0, 256 }
  0x12   : > { %p477_p13 = scmp.lt.s32.totalorder %s470_s7, %s732_s0  ;;  %p478_p0 = scmp.lt.s32.totalorder %s476_s11, %s471_s8 }
  0x13   : > { %p474_p11 = pnand %p473_p10, %p472_p9 }
  0x14   : > { %p479_p1 = por %p478_p0, %p477_p13 }
  0x15   : > { %p475_p12 = pneg %p474_p11 }
  0x17   : > { %p480_p2 = pnand %p479_p1, %p475_p12 }
  0x19   : > { %483 = shalt.err (!%p480_p2)
}
  0x1a   : > { %s567_s19 = smov 256   ;;  %s568_s21 = smov 128  }
  0x1b   : > { %s569_s23 = smov 8   ;;  %p409_p3 = scmp.ge.s32.totalorder %s565_s15, 1 }
  0x1c   : > { %427 = dma.hbm_to_vmem [thread:$0]  (!%p643_p8), %s140_s4, 2048, %s142_s30, %s131_s6, %s567_s19, %s568_s21, %s569_s23  }
  0x1d   : > { %p149_p4 = scmp.lt.s32.totalorder %s565_s15, 3 }
  0x1f   : > { %p150_p5 = pnand %p409_p3, %p149_p4 }
  0x20   : > { %s155_s24 = sand.u32 (!%p150_p5), 1, %s557_s13  }
  0x21   : > { %153 = sbr.rel (%p150_p5) target bundleno = 363 (0x16b), region = 32  ;;  %s410_s25 = sshll.u32 (!%p150_p5), %s155_s24, 7 }
  0x22   : > { %s156_s26 = scalar_lea.sflag (!%p150_p5), [#allocation4], %s155_s24  ;;  %s660_s27 = scalar_lea.vmem (!%p150_p5), [#allocation3], %s410_s25 }
  0x26   : > { %544 = dma.done.wait (%p632_p7), %s156_s26, 2048  }
  0x27   : > { %546 = vsyncadd (%p632_p7), %s156_s26, 4294965248  ;;  %p411_p6 = scmp.ne.s32.totalorder %s611_s16, 0 }
  0x29   : > { %181 = sbr.rel (%p411_p6) target bundleno = 48 (0x30), region = 40 }
  0x2e   : > { %vm182_vm0 = vcmask 517120   ;;  %v570_v0 = vmov 0.0  }
  0x2f   : > { %183 = vst.msk [vmem:[#allocation2] sm:$0x3] %vm182_vm0, %v570_v0 }
  0x30 PF: > { %v193_v1 = vld [vmem:[%s660_s27 + $0x40] sm:$0xff]  ;;  %v187_v3 = vld [vmem:[%s660_s27 + $0x10] sm:$0xff]  ;;  %v194_v4 = vld [vmem:[%s660_s27 + $0x48] sm:$0xff]  ;;  %v249_v25 = vlaneseq  ;;  %vm254_vm1 = vcmask 130112   ;;  %vm258_vm2 = vcmask 195712   ;;  %vm262_vm3 = vcmask 261312  }
  0x31   : > { %v185_v2 = vld [vmem:[%s660_s27] sm:$0xff]  ;;  %217 = vadd.xlane.f32.xlu1 %v193_v1  ;;  %205 = vadd.xlane.f32.xlu2 %v187_v3  ;;  %v186_v5 = vld [vmem:[%s660_s27 + $0x8] sm:$0xff]  ;;  %v195_v6 = vld [vmem:[%s660_s27 + $0x50] sm:$0xff]  ;;  %vm266_vm4 = vcmask 326912   ;;  %vm270_vm5 = vcmask 392512   ;;  %vm274_vm6 = vcmask 458112  }
  0x32   : > { %201 = vadd.xlane.f32.xlu0 %v185_v2  ;;  %v196_v7 = vld [vmem:[%s660_s27 + $0x58] sm:$0xff]  ;;  %v189_v9 = vld [vmem:[%s660_s27 + $0x20] sm:$0xff]  ;;  %v190_v10 = vld [vmem:[%s660_s27 + $0x28] sm:$0xff]  ;;  %v250_v27 = vand.u32 127, %v249_v25  ;;  %vm278_vm7 = vcmask 523712   ;;  %vm295_vm8 = vcmask 1041409  }
  0x33   : > { %v188_v8 = vld [vmem:[%s660_s27 + $0x18] sm:$0xff]  ;;  %v197_v11 = vld [vmem:[%s660_s27 + $0x60] sm:$0xff]  ;;  %v198_v12 = vld [vmem:[%s660_s27 + $0x68] sm:$0xff]  ;;  %vm299_vm9 = vcmask 517120   ;;  %p412_p7 = scmp.ne.s32.totalorder %s611_s16, 1 }
  0x34   : > { %v199_v13 = vld [vmem:[%s660_s27 + $0x70] sm:$0xff]  ;;  %v192_v15 = vld [vmem:[%s660_s27 + $0x38] sm:$0xff]  ;;  %v252_v28 = vadd.s32 4294967288, %v250_v27  ;;  %v256_v31 = vadd.s32 4294967280, %v250_v27  ;;  %v260_v34 = vadd.s32 4294967272, %v250_v27  ;;  %v264_v39 = vadd.s32 4294967264, %v250_v27 }
  0x35   : > { %v191_v14 = vld [vmem:[%s660_s27 + $0x30] sm:$0xff]  ;;  %v200_v16 = vld [vmem:[%s660_s27 + $0x78] sm:$0xff]  ;;  %v268_v42 = vadd.s32 4294967256, %v250_v27  ;;  %v272_v44 = vadd.s32 4294967248, %v250_v27  ;;  %v276_v54 = vadd.s32 4294967240, %v250_v27 }
  0x39   : > { %219 = vadd.xlane.f32.xlu1 %v194_v4  ;;  %221 = vadd.xlane.f32.xlu2 %v195_v6  ;;  %v184_v6 = vld [vmem:[#allocation2] sm:$0x3] }
  0x3a   : > { %203 = vadd.xlane.f32.xlu0 %v186_v5 }
  0x41   : > { %223 = vadd.xlane.f32.xlu1 %v196_v7  ;;  %209 = vadd.xlane.f32.xlu2 %v189_v9 }
  0x42   : > { %207 = vadd.xlane.f32.xlu0 %v188_v8 }
  0x49   : > { %211 = vadd.xlane.f32.xlu1 %v190_v10  ;;  %227 = vadd.xlane.f32.xlu2 %v198_v12 }
  0x4a   : > { %225 = vadd.xlane.f32.xlu0 %v197_v11 }
  0x51   : > { %229 = vadd.xlane.f32.xlu1 %v199_v13  ;;  %215 = vadd.xlane.f32.xlu2 %v192_v15 }
  0x52   : > { %213 = vadd.xlane.f32.xlu0 %v191_v14 }
  0x5a   : > { %231 = vadd.xlane.f32.xlu0 %v200_v16 }
  0xa4   : > { %v218_v17 = vpop.xlane.xlu1 %217  ;;  %v206_v19 = vpop.xlane.xlu2 %205 }
  0xa5   : > { %v202_v18 = vpop.xlane.xlu0 %201  ;;  %v280_v35 = vperm.slane %v218_v17, %v250_v27  ;;  %v257_v38 = vperm.slane %v206_v19, %v256_v31 }
  0xa6   : > { %v251_v36 = vperm.slane %v202_v18, %v250_v27 }
  0xac   : > { %v220_v20 = vpop.xlane.xlu1 %219  ;;  %v222_v22 = vpop.xlane.xlu2 %221 }
  0xad   : > { %v204_v21 = vpop.xlane.xlu0 %203  ;;  %v281_v37 = vperm.slane %v220_v20, %v252_v28  ;;  %v283_v43 = vperm.slane %v222_v22, %v256_v31 }
  0xae   : > { %v253_v33 = vperm.slane %v204_v21, %v252_v28 }
  0xaf   : > { %v282_v46 = vsel %vm254_vm1, %v281_v37, %v280_v35 }
  0xb0   : > { %v255_v40 = vsel %vm254_vm1, %v253_v33, %v251_v36  ;;  %v284_v55 = vsel %vm258_vm2, %v283_v43, %v282_v46 }
  0xb1   : > { %v259_v48 = vsel %vm258_vm2, %v257_v38, %v255_v40 }
  0xb4   : > { %v224_v23 = vpop.xlane.xlu1 %223  ;;  %v210_v26 = vpop.xlane.xlu2 %209 }
  0xb5   : > { %v208_v24 = vpop.xlane.xlu0 %207  ;;  %v285_v47 = vperm.slane %v224_v23, %v260_v34  ;;  %v265_v49 = vperm.slane %v210_v26, %v264_v39 }
  0xb6   : > { %v261_v41 = vperm.slane %v208_v24, %v260_v34 }
  0xb7   : > { %v286_v58 = vsel %vm262_vm3, %v285_v47, %v284_v55 }
  0xb8   : > { %v263_v51 = vsel %vm262_vm3, %v261_v41, %v259_v48 }
  0xb9   : > { %v267_v60 = vsel %vm266_vm4, %v265_v49, %v263_v51 }
  0xbc   : > { %v212_v30 = vpop.xlane.xlu1 %211  ;;  %v228_v32 = vpop.xlane.xlu2 %227 }
  0xbd   : > { %v226_v29 = vpop.xlane.xlu0 %225  ;;  %v269_v52 = vperm.slane %v212_v30, %v268_v42  ;;  %v289_v59 = vperm.slane %v228_v32, %v268_v42 }
  0xbe   : > { %v287_v50 = vperm.slane %v226_v29, %v264_v39 }
  0xbf   : > { %v271_v63 = vsel %vm270_vm5, %v269_v52, %v267_v60 }
  0xc0   : > { %v288_v61 = vsel %vm266_vm4, %v287_v50, %v286_v58 }
  0xc1   : > { %v290_v3 = vsel %vm270_vm5, %v289_v59, %v288_v61 }
  0xc4   : > { %v230_v53 = vpop.xlane.xlu1 %229  ;;  %v216_v57 = vpop.xlane.xlu2 %215 }
  0xc5   : > { %v214_v45 = vpop.xlane.xlu0 %213  ;;  %v291_v62 = vperm.slane %v230_v53, %v272_v44  ;;  %v277_v0 = vperm.slane %v216_v57, %v276_v54 }
  0xc6   : > { %v273_v56 = vperm.slane %v214_v45, %v272_v44 }
  0xc7   : > { %v292_v5 = vsel %vm274_vm6, %v291_v62, %v290_v3 }
  0xc8   : > { %v275_v1 = vsel %vm274_vm6, %v273_v56, %v271_v63 }
  0xc9   : > { %v279_v7 = vsel %vm278_vm7, %v277_v0, %v275_v1 }
  0xcd   : > { %v232_v2 = vpop.xlane.xlu0 %231 }
  0xce   : > { %v293_v4 = vperm.slane %v232_v2, %v276_v54 }
  0xd0   : > { %v294_v8 = vsel %vm278_vm7, %v293_v4, %v292_v5  ;;  %304 = sbr.rel (%p412_p7) target bundleno = 358 (0x166), region = 44 }
  0xd1   : > { %v296_v9 = vsel %vm295_vm8, %v294_v8, %v279_v7 }
  0xd2   : > { %v298_v10 = vadd.f32 %v296_v9, %v184_v6 }
  0xd4   : > { %300 = vst.msk [vmem:[#allocation2] sm:$0x3] %vm299_vm9, %v298_v10 }
  0xd5   : > { %v314_v11 = vld [vmem:[%s733_s1 + $0x38] sm:$0xff]  ;;  %v313_v12 = vld [vmem:[%s733_s1 + $0x30] sm:$0xff]  ;;  %v312_v13 = vld [vmem:[%s733_s1 + $0x28] sm:$0xff]  ;;  %vm319_vm10 = vcmask 523264   ;;  %vm343_vm11 = vcmask 9216  }
  0xd6   : > { %331 = vmatpush.msra.mxu0 %v314_v11  ;;  %v311_v14 = vld [vmem:[%s733_s1 + $0x20] sm:$0xff]  ;;  %v310_v15 = vld [vmem:[%s733_s1 + $0x18] sm:$0xff]  ;;  %v309_v16 = vld [vmem:[%s733_s1 + $0x10] sm:$0xff] }
  0xd7   : > { %v308_v18 = vld [vmem:[%s733_s1 + $0x8] sm:$0xff]  ;;  %v307_v19 = vld [vmem:[%s733_s1] sm:$0xff] }
  0xd8   : > { %332 = vmatpush.msra.mxu0 %v313_v12  ;;  %v468_v21 = vld [vmem:[%s734_s2] ss:$0 sm:$0xff] }
  0xda   : > { %333 = vmatpush.msra.mxu0 %v312_v13 }
  0xdb   : > { %v305_v17 = vld [vmem:[#allocation2] sm:$0x3] }
  0xdc   : > { %334 = vmatpush.msra.mxu0 %v311_v14  ;;  %v306_v20 = vmul.f32 0.00390625, %v305_v17 }
  0xde   : > { %335 = vmatpush.msra.mxu0 %v310_v15 }
  0xe0   : > { %336 = vmatpush.msra.mxu0 %v309_v16 }
  0xe2   : > { %337 = vmatpush.msra.mxu0 %v308_v18 }
  0xe4   : > { %338 = vmatpush.msra.mxu0 %v307_v19 }
  0xe5   : > { %413 = vmatmul.msk.f32.vlgmr.msra.gmra.mxu0 %vm319_vm10, %v306_v20 }
 0x162   : > { %v340_v22 = vpop.f32.mrf.mxu0 }
 0x163   : > { %v341_v23 = vadd.f32 %v468_v21, %v340_v22 }
 0x165   : > { %344 = vst.msk [vmem:[#allocation6] sm:$0x3] %vm343_vm11, %v341_v23 }
 0x166 PF: > { %p429_p8 = scmp.eq.s32.totalorder %s611_s16, 1  ;;  %s571_s24 = smov [#allocation6]  }
 0x167   : > { %s351_s25 = sshll.u32 %s571_s24, 4  ;;  %s353_s15 = sshll.u32 %s735_s3, 4  ;;  %s352_s25 = int_to_ptr.vmem [resolvable:$true] %s351_s25  ;;  %s354_s15 = int_to_ptr.hbm [resolvable:$true] %s353_s15 }
 0x168   : > { %421 = dma.vmem_to_hbm [thread:$0]  (%p429_p8), %s352_s25, 32, %s354_s15, [#allocation5]  }
 0x169   : > { %548 = dma.done.wait (%p429_p8), [#allocation5], 32  }
 0x16a   : > { %550 = vsyncadd (%p429_p8), [#allocation5], 4294967264 }
 0x16b PF: > { %p14_p9 = scmp.ge.s32.totalorder %s614_s17, 4   ;;  %s739_s12 = smov %s557_s13 }
 0x16c   : > { %s740_s13 = smov %s561_s14  ;;  %s741_s14 = smov %s624_s20 }
 0x16d   : > { %s742_s15 = smov %s614_s17  ;;  %16 = sbr.rel (!%p14_p9) target bundleno = 4 (0x4), region = 77 }
 0x172   :  { %367 = vsyncpa [#allocation4], 1 }
 0x173   :  { %369 = vsyncpa [#allocation4 + $0x1], 1 }
 0x174   :  { %370 = vsyncpa [#allocation5], 1 }
 0x175   :  { %372 = vsyncpa [#allocation5 + $0x1], 1 }

</bundles_post_ra>
